<compile_context>
chip_gen: v5e
topology: v5e:2x2
jax: 0.10.0
libtpu: 0.0.40
codegen_flags: <defaults>
</compile_context>

<pallas_src>
import jax
import jax.numpy as jnp
from jax.experimental import pallas as pl
from jax.experimental.pallas import tpu as pltpu

INPUT_SIZE = 4      # iris features (X_train.shape[1])
HIDDEN_SIZE = 16
OUTPUT_SIZE = 3     # len(iris.target_names)


def _round_up(n, m):
    return ((n + m - 1) // m) * m


def iris_mlp_kernel(x_ref, w1_ref, b1_ref, w2_ref, b2_ref, o_ref):
    # fc1 + ReLU (f32 accumulate on the MXU, bias/ReLU on the VPU).
    h = jnp.dot(x_ref[...], w1_ref[...],
                preferred_element_type=jnp.float32) + b1_ref[...]
    h = jnp.maximum(h, 0.0)
    # fc2 -> (tb, OUTPUT_SIZE) logits, stored directly (narrow masked store
    # is free here; output HBM traffic is the real bytes only).
    y = jnp.dot(h, w2_ref[...],
                preferred_element_type=jnp.float32) + b2_ref[...]
    o_ref[...] = y.astype(o_ref.dtype)


def prepare_params(w1, b1, w2, b2):
    """One-time parameter preparation (hoisted out of the forward hot path).

    w1: [IN, HIDDEN], b1: [HIDDEN], w2: [HIDDEN, OUT], b2: [OUT]
    Returns 2-D, tile-aligned views the kernel consumes without any slicing.
    """
    return (jnp.asarray(w1, jnp.float32),
            jnp.asarray(b1, jnp.float32).reshape(1, -1),
            jnp.asarray(w2, jnp.float32),
            jnp.asarray(b2, jnp.float32).reshape(1, -1))


def iris_classifier_forward(x, w1, b1_2d, w2, b2_2d, *, block_b=2048):
    """x: [B, IN] f32; params from prepare_params(). Returns logits [B, OUT] f32."""
    batch, in_features = x.shape
    hidden = w1.shape[1]
    out_features = w2.shape[1]
    assert w1.shape == (in_features, hidden)
    assert b1_2d.shape == (1, hidden)
    assert w2.shape == (hidden, out_features)
    assert b2_2d.shape == (1, out_features)

    # Batch tiling: big tiles to amortize per-step overhead, but keep >= 2
    # grid steps (when the batch allows) so v7x can use both TensorCores.
    half = _round_up(pl.cdiv(batch, 2), 8)
    tb = max(8, min(block_b, half))
    padded_b = _round_up(batch, tb)
    if padded_b != batch:
        x = jnp.pad(x, ((0, padded_b - batch), (0, 0)))
    grid = (padded_b // tb,)

    out_padded = pl.pallas_call(
        iris_mlp_kernel,
        out_shape=jax.ShapeDtypeStruct((padded_b, out_features), jnp.float32),
        grid=grid,
        in_specs=[
            pl.BlockSpec((tb, in_features), lambda i: (i, 0)),        # x: batch-tiled
            pl.BlockSpec((in_features, hidden), lambda i: (0, 0)),    # w1: resident
            pl.BlockSpec((1, hidden), lambda i: (0, 0)),              # b1: resident
            pl.BlockSpec((hidden, out_features), lambda i: (0, 0)),   # w2: resident
            pl.BlockSpec((1, out_features), lambda i: (0, 0)),        # b2: resident
        ],
        out_specs=pl.BlockSpec((tb, out_features), lambda i: (i, 0)),  # real-width logits
        compiler_params=pltpu.CompilerParams(
            dimension_semantics=("parallel",)),                        # 2 TCs on v7x
    )(x, w1, b1_2d, w2, b2_2d)

    # Strip batch padding only (padded rows hold relu(b1)@w2+b2 garbage).
    return out_padded[:batch]


def init_params(key):
    """Deterministic synthetic parameters matching nn.Linear shapes.
    PyTorch stores fc.weight as [out, in]; we keep the transposed [in, out]
    layout (mathematically identical forward pass)."""
    k1, k2, k3, k4 = jax.random.split(key, 4)
    bound1 = 1.0 / jnp.sqrt(INPUT_SIZE)
    bound2 = 1.0 / jnp.sqrt(HIDDEN_SIZE)
    w1 = jax.random.uniform(k1, (INPUT_SIZE, HIDDEN_SIZE), jnp.float32,
                            -bound1, bound1)
    b1 = jax.random.uniform(k2, (HIDDEN_SIZE,), jnp.float32, -bound1, bound1)
    w2 = jax.random.uniform(k3, (HIDDEN_SIZE, OUTPUT_SIZE), jnp.float32,
                            -bound2, bound2)
    b2 = jax.random.uniform(k4, (OUTPUT_SIZE,), jnp.float32, -bound2, bound2)
    return w1, b1, w2, b2


if __name__ == "__main__":
    key = jax.random.PRNGKey(0)
    k_params, k_x = jax.random.split(key)
    w1, b1, w2, b2 = init_params(k_params)
    params = prepare_params(w1, b1, w2, b2)   # one-time, outside the hot path

    batch = 8
    x = jax.random.normal(k_x, (batch, INPUT_SIZE), dtype=jnp.float32)

    logits = iris_classifier_forward(x, *params)
    logits = jax.block_until_ready(logits)

    # Pure-JAX reference check (same math: fc1 -> relu -> fc2).
    ref = jnp.maximum(x @ w1 + b1, 0.0) @ w2 + b2
    assert logits.shape == (batch, OUTPUT_SIZE)
    assert jnp.allclose(logits, ref, atol=1e-5, rtol=1e-5)

    print("KERNEL_OK")
</pallas_src>

<mosaic_0001>
module attributes {stable_mosaic.version = 11 : i64} {
  func.func @iris_mlp_kernel(%arg0: i32, %arg1: memref<8x4xf32, #tpu.memory_space<vmem>>, %arg2: memref<4x16xf32, #tpu.memory_space<vmem>>, %arg3: memref<1x16xf32, #tpu.memory_space<vmem>>, %arg4: memref<16x3xf32, #tpu.memory_space<vmem>>, %arg5: memref<1x3xf32, #tpu.memory_space<vmem>>, %arg6: memref<8x3xf32, #tpu.memory_space<vmem>>) attributes {dimension_semantics = [#tpu.dimension_semantics<parallel>], iteration_bounds = array<i64: 1>, scalar_prefetch = 0 : i64, scratch_operands = 0 : i64, tpu.core_type = #tpu.core_type<tc>, window_params = [{transform_indices = @transform_0, window_bounds = array<i64: 8, 4>}, {pipeline_mode = #tpu.pipeline_mode<synchronous>, transform_indices = @transform_1, window_bounds = array<i64: 4, 16>}, {pipeline_mode = #tpu.pipeline_mode<synchronous>, transform_indices = @transform_2, window_bounds = array<i64: 1, 16>}, {pipeline_mode = #tpu.pipeline_mode<synchronous>, transform_indices = @transform_3, window_bounds = array<i64: 16, 3>}, {pipeline_mode = #tpu.pipeline_mode<synchronous>, transform_indices = @transform_4, window_bounds = array<i64: 1, 3>}, {transform_indices = @transform_5, window_bounds = array<i64: 8, 3>}]} {
    %c0 = arith.constant 0 : index
    %c0_0 = arith.constant 0 : index
    %0 = vector.load %arg1[%c0, %c0_0] : memref<8x4xf32, #tpu.memory_space<vmem>>, vector<8x4xf32>
    %c0_1 = arith.constant 0 : index
    %c0_2 = arith.constant 0 : index
    %1 = vector.load %arg2[%c0_1, %c0_2] : memref<4x16xf32, #tpu.memory_space<vmem>>, vector<4x16xf32>
    %cst = arith.constant dense<0.000000e+00> : vector<8x16xf32>
    %2 = tpu.matmul %0, %1, %cst {dimension_numbers = #tpu.dot_dimension_numbers<[1], [0], [0], [1], [0, 0, 1, 1], [], []>} : vector<8x4xf32>, vector<4x16xf32>, vector<8x16xf32> -> vector<8x16xf32>
    %c0_3 = arith.constant 0 : index
    %c0_4 = arith.constant 0 : index
    %3 = vector.load %arg3[%c0_3, %c0_4] : memref<1x16xf32, #tpu.memory_space<vmem>>, vector<1x16xf32>
    %4 = vector.broadcast %3 : vector<1x16xf32> to vector<8x16xf32>
    %5 = arith.addf %2, %4 : vector<8x16xf32>
    %cst_5 = arith.constant 0.000000e+00 : f32
    %6 = vector.broadcast %cst_5 : f32 to vector<8x16xf32>
    %7 = arith.maximumf %5, %6 : vector<8x16xf32>
    %c0_6 = arith.constant 0 : index
    %c0_7 = arith.constant 0 : index
    %8 = vector.load %arg4[%c0_6, %c0_7] : memref<16x3xf32, #tpu.memory_space<vmem>>, vector<16x3xf32>
    %cst_8 = arith.constant dense<0.000000e+00> : vector<8x3xf32>
    %9 = tpu.matmul %7, %8, %cst_8 {dimension_numbers = #tpu.dot_dimension_numbers<[1], [0], [0], [1], [0, 0, 1, 1], [], []>} : vector<8x16xf32>, vector<16x3xf32>, vector<8x3xf32> -> vector<8x3xf32>
    %c0_9 = arith.constant 0 : index
    %c0_10 = arith.constant 0 : index
    %10 = vector.load %arg5[%c0_9, %c0_10] : memref<1x3xf32, #tpu.memory_space<vmem>>, vector<1x3xf32>
    %11 = vector.broadcast %10 : vector<1x3xf32> to vector<8x3xf32>
    %12 = arith.addf %9, %11 : vector<8x3xf32>
    %c0_11 = arith.constant 0 : index
    %c0_12 = arith.constant 0 : index
    %13 = vector.load %arg6[%c0_11, %c0_12] : memref<8x3xf32, #tpu.memory_space<vmem>>, vector<8x3xf32>
    tpu.vector_store %arg6[%c0_11, %c0_12], %12 {strides = array<i32>} : memref<8x3xf32, #tpu.memory_space<vmem>>, vector<8x3xf32>,
    return
  }
  func.func @transform_0(%arg0: i32) -> (i32, i32) {
    %c0_i32 = arith.constant 0 : i32
    %c0_i32_0 = arith.constant 0 : i32
    return %arg0, %c0_i32 : i32, i32
  }
  func.func @transform_1(%arg0: i32) -> (i32, i32) {
    %c0_i32 = arith.constant 0 : i32
    %c0_i32_0 = arith.constant 0 : i32
    %c0_i32_1 = arith.constant 0 : i32
    return %c0_i32, %c0_i32_0 : i32, i32
  }
  func.func @transform_2(%arg0: i32) -> (i32, i32) {
    %c0_i32 = arith.constant 0 : i32
    %c0_i32_0 = arith.constant 0 : i32
    %c0_i32_1 = arith.constant 0 : i32
    return %c0_i32, %c0_i32_0 : i32, i32
  }
  func.func @transform_3(%arg0: i32) -> (i32, i32) {
    %c0_i32 = arith.constant 0 : i32
    %c0_i32_0 = arith.constant 0 : i32
    %c0_i32_1 = arith.constant 0 : i32
    return %c0_i32, %c0_i32_0 : i32, i32
  }
  func.func @transform_4(%arg0: i32) -> (i32, i32) {
    %c0_i32 = arith.constant 0 : i32
    %c0_i32_0 = arith.constant 0 : i32
    %c0_i32_1 = arith.constant 0 : i32
    return %c0_i32, %c0_i32_0 : i32, i32
  }
  func.func @transform_5(%arg0: i32) -> (i32, i32) {
    %c0_i32 = arith.constant 0 : i32
    %c0_i32_0 = arith.constant 0 : i32
    return %arg0, %c0_i32 : i32, i32
  }
}

</mosaic_0001>

<bundles_post_ra>
// kernel: tpu_custom_call.1
= control target key start
LH: loop header
LB: loop body
LE: loop exit
PB: predicated region body
PF: predicated region fallthrough
CT: control target
= control target key end

     0   :  { %vm30_vm0 = vcmask 1043456   ;;  %vm26_vm1 = vcmask 31744   ;;  %vm61_vm2 = vcmask 130048   ;;  %vm85_vm3 = vcmask 23552   ;;  %s147_s1 = inlined_call_operand.vmem [shape: f32[4,16], index: 1, kind: input, shape index: {}]   ;;  %s148_s0 = inlined_call_operand.vmem [shape: f32[8,4], index: 0, kind: input, shape index: {}]   ;;  %s149_s2 = inlined_call_operand.vmem [shape: f32[1,16], index: 2, kind: input, shape index: {}]   ;;  %s150_s4 = inlined_call_operand.vmem [shape: f32[1,3], index: 4, kind: input, shape index: {}]   ;;  %s151_s3 = inlined_call_operand.vmem [shape: f32[16,3], index: 3, kind: input, shape index: {}]   ;;  %s152_s5 = inlined_call_operand.vmem [shape: f32[8,3], index: 5, kind: output, shape index: {}]  }
   0x1   :  { %v21_v0 = vld [vmem:[%s147_s1] sm:$0xf]  ;;  %v56_v2 = vld [vmem:[%s151_s3 + $0x8] sm:$0xff] }
   0x2   :  { %v20_v1 = vld [vmem:[%s148_s0] sm:$0xff]  ;;  %91 = vmatpush.msk.msra.mxu0 %vm30_vm0, %v21_v0  ;;  %79 = vmatpush.msra.mxu1 %v56_v2 }
   0x3   :  { %92 = vmatmul.msk.f32.vlgmr.msra.gmra.mxu0 %vm26_vm1, %v20_v1  ;;  %v55_v3 = vld [vmem:[%s151_s3] sm:$0xff] }
   0x4   :  { %80 = vmatpush.msra.mxu1 %v55_v3  ;;  %v94_v4 = vld [vmem:[%s149_s2] ss:$0 sm:$0xff] }
   0x5   :  { %v95_v8 = vld [vmem:[%s150_s4] ss:$0 sm:$0xff] }
  0x80   :  { %v51_v5 = vpop.f32.mrf.mxu0 }
  0x81   :  { %v52_v6 = vadd.f32 %v94_v4, %v51_v5 }
  0x83   :  { %v54_v7 = vmax.f32 %v52_v6, 0.0 }
  0x85   :  { %93 = vmatmul.msk.f32.vlgmr.msra.gmra.mxu1 %vm61_vm2, %v54_v7 }
 0x102   :  { %v82_v9 = vpop.f32.mrf.mxu1 }
 0x103   :  { %v83_v10 = vadd.f32 %v95_v8, %v82_v9 }
 0x105   :  { %86 = vst.msk [vmem:[%s152_s5] sm:$0xff] %vm85_vm3, %v83_v10 }

</bundles_post_ra>
